<compile_context>
chip_gen: v7x
topology: tpu7x:2x2x1
jax: 0.10.0
libtpu: 0.0.40
codegen_flags: <defaults>
</compile_context>

<pallas_src>
import functools

import jax
import jax.numpy as jnp
from jax.experimental import pallas as pl
from jax.experimental.pallas import tpu as pltpu

LANE = 128          # TPU lane width: all feature dims padded to this
TB = 128            # batch-tile rows per grid step (multiple of 8)
NEG_INF = -1e30     # bias padding for unused action columns (masked in softmax)


def _leaky_relu(x, slope=0.01):
    return jnp.where(x > 0, x, slope * x)


def mlp_kernel(x_ref, w1_ref, w2_ref, wo_ref, b_ref, out_ref):
    """One batch tile of the MLP forward.

    x_ref  : (TB, LANE)   bf16  state features, zero-padded to LANE
    w*_ref : (LANE, LANE) bf16  zero-padded weights, stored [in, out]
    b_ref  : (8, LANE)    f32   row0=b1, row1=b2, row2=b_out (pad cols = NEG_INF)
    out_ref: (TB, LANE)   f32   softmax probs (padded action cols == 0)
    """
    b1 = b_ref[0:1, :]
    b2 = b_ref[1:2, :]
    bo = b_ref[2:3, :]

    # hidden layer 1: Linear + LeakyReLU (+ Dropout in eval mode == identity)
    h = jnp.dot(x_ref[...], w1_ref[...], preferred_element_type=jnp.float32)
    h = _leaky_relu(h + b1)

    # hidden layer 2: Linear + LeakyReLU (+ Dropout identity)
    h = jnp.dot(h.astype(jnp.bfloat16), w2_ref[...],
                preferred_element_type=jnp.float32)
    h = _leaky_relu(h + b2)

    # output layer: Linear
    logits = jnp.dot(h.astype(jnp.bfloat16), wo_ref[...],
                     preferred_element_type=jnp.float32) + bo

    # last activation: softmax over actions; padded cols carry NEG_INF -> exp==0
    m = jnp.max(logits, axis=-1, keepdims=True)
    e = jnp.exp(logits - m)
    inv = pl.reciprocal(jnp.sum(e, axis=-1, keepdims=True), approx=True)
    out_ref[...] = (e * inv).astype(out_ref.dtype)


def pack_params(params):
    """Pad raw (w1,b1,w2,b2,wo,bo) params to lane-dense bf16 weights + one f32 bias pack."""
    w1, b1, w2, b2, wo, bo = params

    def pad_w(w):
        p = jnp.zeros((LANE, LANE), jnp.float32)
        p = p.at[: w.shape[0], : w.shape[1]].set(w)
        return p.astype(jnp.bfloat16)

    w1p, w2p, wop = pad_w(w1), pad_w(w2), pad_w(wo)

    bpack = jnp.zeros((8, LANE), jnp.float32)
    bpack = bpack.at[0, : b1.shape[-1]].set(b1.reshape(-1))
    bpack = bpack.at[1, : b2.shape[-1]].set(b2.reshape(-1))
    bpack = bpack.at[2, :].set(NEG_INF)                      # mask padded actions
    bpack = bpack.at[2, : bo.shape[-1]].set(bo.reshape(-1))
    return w1p, w2p, wop, bpack


@functools.partial(jax.jit, static_argnames=("action_size",))
def network_forward(x, w1p, w2p, wop, bpack, *, action_size):
    """x: [B, state_size] f32 -> [B, action_size] f32 softmax probs."""
    B, S = x.shape
    Bp = ((B + TB - 1) // TB) * TB

    xp = jnp.zeros((Bp, LANE), jnp.bfloat16)
    xp = xp.at[:B, :S].set(x.astype(jnp.bfloat16))

    out = pl.pallas_call(
        mlp_kernel,
        out_shape=jax.ShapeDtypeStruct((Bp, LANE), jnp.float32),
        grid=(Bp // TB,),
        in_specs=[
            pl.BlockSpec((TB, LANE), lambda i: (i, 0)),      # x: tiled over batch
            pl.BlockSpec((LANE, LANE), lambda i: (0, 0)),    # w1: resident
            pl.BlockSpec((LANE, LANE), lambda i: (0, 0)),    # w2: resident
            pl.BlockSpec((LANE, LANE), lambda i: (0, 0)),    # wo: resident
            pl.BlockSpec((8, LANE), lambda i: (0, 0)),       # packed biases: resident
        ],
        out_specs=pl.BlockSpec((TB, LANE), lambda i: (i, 0)),
        compiler_params=pltpu.CompilerParams(
            dimension_semantics=("parallel",)),
    )(xp, w1p, w2p, wop, bpack)

    return out[:B, :action_size]


def init_params(key, state_size, layer_numbers, action_size):
    """Deterministic init mimicking nn.Linear's U(-1/sqrt(fan_in), 1/sqrt(fan_in))."""
    params = []
    dims = [state_size] + list(layer_numbers) + [action_size]
    for i in range(len(dims) - 1):
        fan_in, fan_out = dims[i], dims[i + 1]
        key, kw, kb = jax.random.split(key, 3)
        bound = 1.0 / (fan_in ** 0.5)
        w = jax.random.uniform(kw, (fan_in, fan_out), jnp.float32, -bound, bound)
        b = jax.random.uniform(kb, (1, fan_out), jnp.float32, -bound, bound)
        params.extend([w, b])
    return params


def reference_forward(x, params):
    """Pure-JAX reference using the same bf16-matmul / f32-epilogue recipe."""
    w1, b1, w2, b2, wo, bo = params
    bf = jnp.bfloat16
    h = jnp.dot(x.astype(bf), w1.astype(bf), preferred_element_type=jnp.float32) + b1
    h = _leaky_relu(h)
    h = jnp.dot(h.astype(bf), w2.astype(bf), preferred_element_type=jnp.float32) + b2
    h = _leaky_relu(h)
    logits = jnp.dot(h.astype(bf), wo.astype(bf), preferred_element_type=jnp.float32) + bo
    return jax.nn.softmax(logits, axis=-1)


if __name__ == "__main__":
    STATE_SIZE = 32
    LAYER_NUMBERS = [64, 64]
    ACTION_SIZE = 8

    key = jax.random.PRNGKey(0)
    key, kx_small, kx_big = jax.random.split(key, 3)
    params = init_params(key, STATE_SIZE, LAYER_NUMBERS, ACTION_SIZE)
    w1p, w2p, wop, bpack = pack_params(params)

    # small batch (typical single RL step) and a larger batch exercising the grid
    for kx, B in ((kx_small, 8), (kx_big, 256)):
        x = jax.random.normal(kx, (B, STATE_SIZE), jnp.float32)

        out = network_forward(x, w1p, w2p, wop, bpack, action_size=ACTION_SIZE)
        jax.block_until_ready(out)

        assert out.shape == (B, ACTION_SIZE)
        # softmax rows sum to 1 (approx reciprocal -> relaxed tolerance)
        assert bool(jnp.allclose(jnp.sum(out, axis=-1), 1.0, atol=5e-3))
        # matches the pure-JAX reference (same bf16 matmul recipe)
        ref = reference_forward(x, params)
        assert bool(jnp.allclose(out, ref, atol=1e-2)), float(jnp.max(jnp.abs(out - ref)))

    print("KERNEL_OK")
</pallas_src>

<mosaic_0001>
module attributes {stable_mosaic.version = 11 : i64} {
  func.func @mlp_kernel(%arg0: i32, %arg1: memref<128x128xbf16, #tpu.memory_space<vmem>>, %arg2: memref<128x128xbf16, #tpu.memory_space<vmem>>, %arg3: memref<128x128xbf16, #tpu.memory_space<vmem>>, %arg4: memref<128x128xbf16, #tpu.memory_space<vmem>>, %arg5: memref<8x128xf32, #tpu.memory_space<vmem>>, %arg6: memref<128x128xf32, #tpu.memory_space<vmem>>) attributes {dimension_semantics = [#tpu.dimension_semantics<parallel>], iteration_bounds = array<i64: 1>, scalar_prefetch = 0 : i64, scratch_operands = 0 : i64, tpu.core_type = #tpu.core_type<tc>, window_params = [{transform_indices = @transform_0, window_bounds = array<i64: 128, 128>}, {pipeline_mode = #tpu.pipeline_mode<synchronous>, transform_indices = @transform_1, window_bounds = array<i64: 128, 128>}, {pipeline_mode = #tpu.pipeline_mode<synchronous>, transform_indices = @transform_2, window_bounds = array<i64: 128, 128>}, {pipeline_mode = #tpu.pipeline_mode<synchronous>, transform_indices = @transform_3, window_bounds = array<i64: 128, 128>}, {pipeline_mode = #tpu.pipeline_mode<synchronous>, transform_indices = @transform_4, window_bounds = array<i64: 8, 128>}, {transform_indices = @transform_5, window_bounds = array<i64: 128, 128>}]} {
    %c0 = arith.constant 0 : index
    %c0_0 = arith.constant 0 : index
    %0 = vector.load %arg5[%c0, %c0_0] : memref<8x128xf32, #tpu.memory_space<vmem>>, vector<1x128xf32>
    %c1 = arith.constant 1 : index
    %c0_1 = arith.constant 0 : index
    %1 = vector.load %arg5[%c1, %c0_1] : memref<8x128xf32, #tpu.memory_space<vmem>>, vector<1x128xf32>
    %c2 = arith.constant 2 : index
    %c0_2 = arith.constant 0 : index
    %2 = vector.load %arg5[%c2, %c0_2] : memref<8x128xf32, #tpu.memory_space<vmem>>, vector<1x128xf32>
    %c0_3 = arith.constant 0 : index
    %c0_4 = arith.constant 0 : index
    %3 = vector.load %arg1[%c0_3, %c0_4] : memref<128x128xbf16, #tpu.memory_space<vmem>>, vector<128x128xbf16>
    %c0_5 = arith.constant 0 : index
    %c0_6 = arith.constant 0 : index
    %4 = vector.load %arg2[%c0_5, %c0_6] : memref<128x128xbf16, #tpu.memory_space<vmem>>, vector<128x128xbf16>
    %cst = arith.constant dense<0.000000e+00> : vector<128x128xf32>
    %5 = tpu.matmul %3, %4, %cst {dimension_numbers = #tpu.dot_dimension_numbers<[1], [0], [0], [1], [0, 0, 1, 1], [], []>} : vector<128x128xbf16>, vector<128x128xbf16>, vector<128x128xf32> -> vector<128x128xf32>
    %6 = vector.broadcast %0 : vector<1x128xf32> to vector<128x128xf32>
    %7 = arith.addf %5, %6 : vector<128x128xf32>
    %cst_7 = arith.constant 0.000000e+00 : f32
    %8 = vector.broadcast %cst_7 : f32 to vector<128x128xf32>
    %9 = arith.cmpf ogt, %7, %8 : vector<128x128xf32>
    %cst_8 = arith.constant 0.00999999977 : f32
    %10 = vector.broadcast %cst_8 : f32 to vector<128x128xf32>
    %11 = arith.mulf %10, %7 : vector<128x128xf32>
    %12 = arith.select %9, %7, %11 : vector<128x128xi1>, vector<128x128xf32>
    %13 = arith.truncf %12 : vector<128x128xf32> to vector<128x128xbf16>
    %c0_9 = arith.constant 0 : index
    %c0_10 = arith.constant 0 : index
    %14 = vector.load %arg3[%c0_9, %c0_10] : memref<128x128xbf16, #tpu.memory_space<vmem>>, vector<128x128xbf16>
    %cst_11 = arith.constant dense<0.000000e+00> : vector<128x128xf32>
    %15 = tpu.matmul %13, %14, %cst_11 {dimension_numbers = #tpu.dot_dimension_numbers<[1], [0], [0], [1], [0, 0, 1, 1], [], []>} : vector<128x128xbf16>, vector<128x128xbf16>, vector<128x128xf32> -> vector<128x128xf32>
    %16 = vector.broadcast %1 : vector<1x128xf32> to vector<128x128xf32>
    %17 = arith.addf %15, %16 : vector<128x128xf32>
    %cst_12 = arith.constant 0.000000e+00 : f32
    %18 = vector.broadcast %cst_12 : f32 to vector<128x128xf32>
    %19 = arith.cmpf ogt, %17, %18 : vector<128x128xf32>
    %cst_13 = arith.constant 0.00999999977 : f32
    %20 = vector.broadcast %cst_13 : f32 to vector<128x128xf32>
    %21 = arith.mulf %20, %17 : vector<128x128xf32>
    %22 = arith.select %19, %17, %21 : vector<128x128xi1>, vector<128x128xf32>
    %23 = arith.truncf %22 : vector<128x128xf32> to vector<128x128xbf16>
    %c0_14 = arith.constant 0 : index
    %c0_15 = arith.constant 0 : index
    %24 = vector.load %arg4[%c0_14, %c0_15] : memref<128x128xbf16, #tpu.memory_space<vmem>>, vector<128x128xbf16>
    %cst_16 = arith.constant dense<0.000000e+00> : vector<128x128xf32>
    %25 = tpu.matmul %23, %24, %cst_16 {dimension_numbers = #tpu.dot_dimension_numbers<[1], [0], [0], [1], [0, 0, 1, 1], [], []>} : vector<128x128xbf16>, vector<128x128xbf16>, vector<128x128xf32> -> vector<128x128xf32>
    %26 = vector.broadcast %2 : vector<1x128xf32> to vector<128x128xf32>
    %27 = arith.addf %25, %26 : vector<128x128xf32>
    %cst_17 = arith.constant dense<0xFF800000> : vector<128xf32>
    %28 = vector.multi_reduction <maximumf>, %27, %cst_17 [1] : vector<128x128xf32> to vector<128xf32>
    %29 = vector.shape_cast %28 : vector<128xf32> to vector<128x1xf32>
    %30 = vector.broadcast %29 : vector<128x1xf32> to vector<128x128xf32>
    %31 = arith.subf %27, %30 : vector<128x128xf32>
    %32 = math.exp %31 : vector<128x128xf32>
    %cst_18 = arith.constant dense<0.000000e+00> : vector<128xf32>
    %33 = vector.multi_reduction <add>, %32, %cst_18 [1] : vector<128x128xf32> to vector<128xf32>
    %34 = vector.shape_cast %33 : vector<128xf32> to vector<128x1xf32>
    %35 = tpu.reciprocal %34 {approx = true} : vector<128x1xf32> -> vector<128x1xf32>
    %36 = vector.broadcast %35 : vector<128x1xf32> to vector<128x128xf32>
    %37 = arith.mulf %32, %36 : vector<128x128xf32>
    %c0_19 = arith.constant 0 : index
    %c0_20 = arith.constant 0 : index
    %38 = vector.load %arg6[%c0_19, %c0_20] : memref<128x128xf32, #tpu.memory_space<vmem>>, vector<128x128xf32>
    tpu.vector_store %arg6[%c0_19, %c0_20], %37 {strides = array<i32>} : memref<128x128xf32, #tpu.memory_space<vmem>>, vector<128x128xf32>,
    return
  }
  func.func @transform_0(%arg0: i32) -> (i32, i32) {
    %c0_i32 = arith.constant 0 : i32
    %c0_i32_0 = arith.constant 0 : i32
    return %arg0, %c0_i32 : i32, i32
  }
  func.func @transform_1(%arg0: i32) -> (i32, i32) {
    %c0_i32 = arith.constant 0 : i32
    %c0_i32_0 = arith.constant 0 : i32
    %c0_i32_1 = arith.constant 0 : i32
    return %c0_i32, %c0_i32_0 : i32, i32
  }
  func.func @transform_2(%arg0: i32) -> (i32, i32) {
    %c0_i32 = arith.constant 0 : i32
    %c0_i32_0 = arith.constant 0 : i32
    %c0_i32_1 = arith.constant 0 : i32
    return %c0_i32, %c0_i32_0 : i32, i32
  }
  func.func @transform_3(%arg0: i32) -> (i32, i32) {
    %c0_i32 = arith.constant 0 : i32
    %c0_i32_0 = arith.constant 0 : i32
    %c0_i32_1 = arith.constant 0 : i32
    return %c0_i32, %c0_i32_0 : i32, i32
  }
  func.func @transform_4(%arg0: i32) -> (i32, i32) {
    %c0_i32 = arith.constant 0 : i32
    %c0_i32_0 = arith.constant 0 : i32
    %c0_i32_1 = arith.constant 0 : i32
    return %c0_i32, %c0_i32_0 : i32, i32
  }
  func.func @transform_5(%arg0: i32) -> (i32, i32) {
    %c0_i32 = arith.constant 0 : i32
    %c0_i32_0 = arith.constant 0 : i32
    return %arg0, %c0_i32 : i32, i32
  }
}

</mosaic_0001>

<bundles_post_ra>
// kernel: network_forward.1
= control target key start
LH: loop header
LB: loop body
LE: loop exit
PB: predicated region body
PF: predicated region fallthrough
CT: control target
= control target key end

     0   :  { %10 = vsyncpa [#allocation3], 0  ;;  %s1557_s0 = inlined_call_operand.vmem [shape: bf16[128,128], index: 0, kind: input, shape index: {}]   ;;  %s1558_s1 = inlined_call_operand.vmem [shape: bf16[128,128], index: 1, kind: input, shape index: {}]   ;;  %s1559_s2 = inlined_call_operand.hbm [shape: bf16[128,128], index: 2, kind: input, shape index: {}]   ;;  %s1560_s3 = inlined_call_operand.hbm [shape: bf16[128,128], index: 3, kind: input, shape index: {}]   ;;  %s1561_s4 = inlined_call_operand.vmem [shape: f32[8,128], index: 4, kind: input, shape index: {}]   ;;  %s1562_s5 = inlined_call_operand.vmem [shape: f32[128,128], index: 5, kind: output, shape index: {}]  }
   0x1   :  { %11 = vsyncpa [#allocation5], 0  ;;  %s1232_s18 = smov [#allocation2]   ;;  %s1184_s22 = scalar_lea.hbm %s1559_s2, 1024 }
   0x2   :  { %s21_s19 = sshll.u32 %s1232_s18, 4  ;;  %p1185_p0 = scmp.ne.s32.totalorder %s1559_s2, %s1184_s22  ;;  %s22_s19 = int_to_ptr.vmem [resolvable:$true] %s21_s19 }
   0x3   :  { %p1188_p1 = scmp.lt.u32.totalorder %s1184_s22, %s1559_s2 }
   0x5   :  { %p1190_p2 = pnand %p1188_p1, %p1185_p0 }
   0x7   :  { %1193 = shalt.err (!%p1190_p2)
}
   0x8   :  { %s1194_s27 = scalar_lea.vmem %s22_s19, 1024  ;;  %p1199_p4 = scmp.lt.s32.totalorder %s22_s19, %s22_s19 }
   0x9   :  { %p1195_p3 = scmp.ne.s32.totalorder %s22_s19, %s1194_s27  ;;  %p1200_p5 = scmp.lt.s32.totalorder %s1194_s27, %s1194_s27 }
   0xb   :  { %p1201_p6 = por %p1200_p5, %p1199_p4 }
   0xd   :  { %p1202_p7 = pnand %p1201_p6, %p1195_p3 }
   0xf   :  { %1205 = shalt.err (!%p1202_p7)
}
  0x10   :  { %s1233_s28 = smov 64   ;;  %s1234_s29 = smov 4  }
  0x11   :  { %27 = dma.hbm_to_vmem [thread:$0]  %s1559_s2, 1024, %s22_s19, [#allocation3], %s1233_s28, %s1233_s28, %s1234_s29  }
  0x12   :  { %s1235_s7 = smov [#allocation4]   ;;  %s1206_s11 = scalar_lea.hbm %s1560_s3, 1024 }
  0x13   :  { %s33_s8 = sshll.u32 %s1235_s7, 4  ;;  %p1207_p8 = scmp.ne.s32.totalorder %s1560_s3, %s1206_s11  ;;  %s34_s8 = int_to_ptr.vmem [resolvable:$true] %s33_s8 }
  0x14   :  { %p1210_p9 = scmp.lt.u32.totalorder %s1206_s11, %s1560_s3 }
  0x16   :  { %p1212_p10 = pnand %p1210_p9, %p1207_p8 }
  0x18   :  { %1215 = shalt.err (!%p1212_p10)
}
  0x19   :  { %s1216_s16 = scalar_lea.vmem %s34_s8, 1024  ;;  %p1221_p12 = scmp.lt.s32.totalorder %s34_s8, %s34_s8 }
  0x1a   :  { %p1217_p11 = scmp.ne.s32.totalorder %s34_s8, %s1216_s16  ;;  %p1222_p13 = scmp.lt.s32.totalorder %s1216_s16, %s1216_s16 }
  0x1c   :  { %p1223_p0 = por %p1222_p13, %p1221_p12 }
  0x1e   :  { %p1224_p1 = pnand %p1223_p0, %p1217_p11 }
  0x20   :  { %1227 = shalt.err (!%p1224_p1)
}
  0x21   :  { %39 = dma.hbm_to_vmem [thread:$0]  %s1560_s3, 1024, %s34_s8, [#allocation5], %s1233_s28, %s1233_s28, %s1234_s29  }
  0x22   :  { %1228 = dma.done.wait [#allocation3], 1024  }
  0x23   :  { %1229 = vsyncadd [#allocation3], 4294966272 }
  0x24   :  { %1230 = dma.done.wait [#allocation5], 1024  }
  0x25   :  { %1231 = vsyncadd [#allocation5], 4294966272  ;;  %v1088_v0 = vld [vmem:[%s1558_s1] sm:$0xff]   ;;  %v1089_v1 = vld [vmem:[%s1558_s1 + $0x8] sm:$0xff]  }
  0x26   :  { %972 = vmatprep.subr.bf16.mxu0 %v1088_v0  ;;  %v1090_v2 = vld [vmem:[%s1558_s1 + $0x10] sm:$0xff]   ;;  %v1091_v3 = vld [vmem:[%s1558_s1 + $0x18] sm:$0xff]   ;;  %v1096_v4 = vld [vmem:[%s1557_s0] sm:$0xff]  }
  0x27   :  { %973 = vmatpush3.bf16.msra.mxu0 %v1088_v0  ;;  %988 = vmatprep.mubr.bf16.mxu0 %v1096_v4  ;;  %v1092_v5 = vld [vmem:[%s1558_s1 + $0x20] sm:$0xff]   ;;  %v1093_v6 = vld [vmem:[%s1558_s1 + $0x28] sm:$0xff]   ;;  %v1094_v9 = vld [vmem:[%s1558_s1 + $0x30] sm:$0xff]  }
  0x28   :  { %974 = vmatprep.subr.bf16.mxu0 %v1089_v1  ;;  %v1104_v7 = vld [vmem:[#allocation2] sm:$0xff]   ;;  %v1105_v8 = vld [vmem:[#allocation2 + $0x8] sm:$0xff]   ;;  %v1106_v10 = vld [vmem:[#allocation2 + $0x10] sm:$0xff]  }
  0x29   :  { %1004 = vmatprep.subr.bf16.mxu1 %v1104_v7  ;;  %v1095_v11 = vld [vmem:[%s1558_s1 + $0x38] sm:$0xff]   ;;  %v1108_v13 = vld [vmem:[#allocation2 + $0x20] sm:$0xff]   ;;  %v1097_v14 = vld [vmem:[%s1557_s0 + $0x8] sm:$0xff]  }
  0x2a   :  { %1005 = vmatpush3.bf16.msra.mxu1 %v1104_v7  ;;  %v1107_v12 = vld [vmem:[#allocation2 + $0x18] sm:$0xff]   ;;  %v1098_v15 = vld [vmem:[%s1557_s0 + $0x10] sm:$0xff]   ;;  %v1100_v17 = vld [vmem:[%s1557_s0 + $0x20] sm:$0xff]  }
  0x2b   :  { %975 = vmatpush3.bf16.msra.mxu0 %v1089_v1  ;;  %1006 = vmatprep.subr.bf16.mxu1 %v1105_v8  ;;  %v1099_v16 = vld [vmem:[%s1557_s0 + $0x18] sm:$0xff]   ;;  %v1101_v18 = vld [vmem:[%s1557_s0 + $0x28] sm:$0xff]   ;;  %v1102_v19 = vld [vmem:[%s1557_s0 + $0x30] sm:$0xff]  }
  0x2c   :  { %976 = vmatprep.subr.bf16.mxu0 %v1090_v2  ;;  %v1103_v20 = vld [vmem:[%s1557_s0 + $0x38] sm:$0xff]   ;;  %v1109_v21 = vld [vmem:[#allocation2 + $0x28] sm:$0xff]   ;;  %v1110_v22 = vld [vmem:[#allocation2 + $0x30] sm:$0xff]  }
  0x2d   :  { %v1111_v23 = vld [vmem:[#allocation2 + $0x38] sm:$0xff]   ;;  %v1112_v24 = vld [vmem:[#allocation4] sm:$0xff]   ;;  %v1338_v25 = vld [vmem:[#allocation4 + $0x8] sm:$0xff]  }
  0x2e   :  { %1007 = vmatpush3.bf16.msra.mxu1 %v1105_v8  ;;  %v1341_v26 = vld [vmem:[#allocation4 + $0x10] sm:$0xff]   ;;  %v1345_v27 = vld [vmem:[#allocation4 + $0x18] sm:$0xff]   ;;  %v1349_v28 = vld [vmem:[#allocation4 + $0x20] sm:$0xff]  }
  0x2f   :  { %977 = vmatpush3.bf16.msra.mxu0 %v1090_v2  ;;  %1008 = vmatprep.subr.bf16.mxu1 %v1106_v10  ;;  %v1353_v29 = vld [vmem:[#allocation4 + $0x28] sm:$0xff]   ;;  %v1361_v30 = vld [vmem:[%s1561_s4] ss:$0 sm:$0xff] }
  0x30   :  { %978 = vmatprep.subr.bf16.mxu0 %v1091_v3 }
  0x32   :  { %1009 = vmatpush3.bf16.msra.mxu1 %v1106_v10 }
  0x33   :  { %979 = vmatpush3.bf16.msra.mxu0 %v1091_v3  ;;  %1010 = vmatprep.subr.bf16.mxu1 %v1107_v12 }
  0x34   :  { %980 = vmatprep.subr.bf16.mxu0 %v1092_v5 }
  0x36   :  { %1011 = vmatpush3.bf16.msra.mxu1 %v1107_v12 }
  0x37   :  { %981 = vmatpush3.bf16.msra.mxu0 %v1092_v5  ;;  %1012 = vmatprep.subr.bf16.mxu1 %v1108_v13 }
  0x38   :  { %982 = vmatprep.subr.bf16.mxu0 %v1093_v6 }
  0x3a   :  { %1013 = vmatpush3.bf16.msra.mxu1 %v1108_v13 }
  0x3b   :  { %983 = vmatpush3.bf16.msra.mxu0 %v1093_v6  ;;  %1014 = vmatprep.subr.bf16.mxu1 %v1109_v21 }
  0x3c   :  { %984 = vmatprep.subr.bf16.mxu0 %v1094_v9 }
  0x3e   :  { %1015 = vmatpush3.bf16.msra.mxu1 %v1109_v21 }
  0x3f   :  { %985 = vmatpush3.bf16.msra.mxu0 %v1094_v9  ;;  %1016 = vmatprep.subr.bf16.mxu1 %v1110_v22 }
  0x40   :  { %986 = vmatprep.subr.bf16.mxu0 %v1095_v11 }
  0x42   :  { %1017 = vmatpush3.bf16.msra.mxu1 %v1110_v22 }
  0x43   :  { %987 = vmatpush3.bf16.msra.mxu0 %v1095_v11  ;;  %1018 = vmatprep.subr.bf16.mxu1 %v1111_v23 }
  0x44   :  { %1036 = vmatprep.subr.bf16.mxu0 %v1112_v24 }
  0x46   :  { %989 = vmatmul.mubr.bf16.vlgmr.msra.gmra.mrb[0].mxu0 %v1097_v14  ;;  %1019 = vmatpush3.bf16.msra.mxu1 %v1111_v23 }
  0x47   :  { %992 = vmatprep.mubr.bf16.mxu0 %v1098_v15  ;;  %1068 = vmatprep.subr.bf16.mxu1 %v1112_v24 }
  0x48   :  { %1037 = vmatpush3.bf16.msra.mxu0 %v1112_v24 }
  0x49   :  { %1038 = vmatprep.subr.bf16.mxu0 %v1338_v25 }
  0x4c   :  { %1039 = vmatpush3.bf16.msra.mxu0 %v1338_v25 }
  0x4d   :  { %1040 = vmatprep.subr.bf16.mxu0 %v1341_v26 }
  0x4e   :  { %993 = vmatmul.mubr.bf16.gmra.mrb[4].mxu0 %v1099_v16 }
  0x4f   :  { %996 = vmatprep.mubr.bf16.mxu0 %v1100_v17 }
  0x50   :  { %1041 = vmatpush3.bf16.msra.mxu0 %v1341_v26 }
  0x51   :  { %1042 = vmatprep.subr.bf16.mxu0 %v1345_v27 }
  0x54   :  { %1043 = vmatpush3.bf16.msra.mxu0 %v1345_v27 }
  0x55   :  { %1044 = vmatprep.subr.bf16.mxu0 %v1349_v28 }
  0x56   :  { %997 = vmatmul.mubr.bf16.gmra.mrb[8].mxu0 %v1101_v18 }
  0x57   :  { %1000 = vmatprep.mubr.bf16.mxu0 %v1102_v19 }
  0x58   :  { %1045 = vmatpush3.bf16.msra.mxu0 %v1349_v28 }
  0x59   :  { %1046 = vmatprep.subr.bf16.mxu0 %v1353_v29 }
  0x5c   :  { %1047 = vmatpush3.bf16.msra.mxu0 %v1353_v29 }
  0x5e   :  { %1001 = vmatmul.mubr.bf16.gmra.mrb[12].mxu0 %v1103_v20 }
 0x119   :  { %v990_v31 = vpop.f32.mrb[0].mxu0 }
 0x11a   :  { %v227_v32 = vadd.f32 %v990_v31, %v1361_v30  ;;  %v218_v33 = vpop.f32.mrb[1].mxu0 }
 0x11b   :  { %v219_v34 = vadd.f32 %v1361_v30, %v218_v33  ;;  %v991_v35 = vpop.f32.mrb[2].mxu0 }
 0x11c   :  { %v299_v36 = vmul.f32 0.01, %v227_v32  ;;  %v230_v37 = vadd.f32 %v991_v35, %v1361_v30  ;;  %v221_v38 = vpop.f32.mrb[3].mxu0  ;;  %vm283_vm0 = vcmp.gt.f32.partialorder %v227_v32, 0.0 }
 0x11d   :  { %v297_v39 = vmul.f32 0.01, %v219_v34  ;;  %v222_v40 = vadd.f32 %v1361_v30, %v221_v38  ;;  %vm281_vm2 = vcmp.gt.f32.partialorder %v219_v34, 0.0 }
 0x11e   :  { %vm284_vm1 = vcmp.gt.f32.partialorder %v230_v37, 0.0  ;;  %v300_v41 = vmul.f32 0.01, %v230_v37  ;;  %v315_v43 = vsel %vm283_vm0, %v227_v32, %v299_v36 }
 0x11f   :  { %v298_v42 = vmul.f32 0.01, %v222_v40  ;;  %vm282_vm3 = vcmp.gt.f32.partialorder %v222_v40, 0.0  ;;  %v313_v46 = vsel %vm281_vm2, %v219_v34, %v297_v39 }
 0x120   :  { %v316_v44 = vsel %vm284_vm1, %v230_v37, %v300_v41 }
 0x121   :  { %v994_v45 = vpop.f32.mrb[4].mxu0  ;;  %v314_v47 = vsel %vm282_vm3, %v222_v40, %v298_v42  ;;  %v330_v48 = vpack.c.bf16 %v316_v44, %v315_v43  ;;  %v1392_v42 = vld [vmem:[%s1561_s4 + $0x1] ss:$0 sm:$0xff] }
 0x122   :  { %v243_v49 = vadd.f32 %v994_v45, %v1361_v30  ;;  %v234_v50 = vpop.f32.mrb[5].mxu0  ;;  %v329_v51 = vpack.c.bf16 %v314_v47, %v313_v46 }
 0x123   :  { %v235_v52 = vadd.f32 %v1361_v30, %v234_v50  ;;  %v995_v53 = vpop.f32.mrb[6].mxu0 }
 0x124   :  { %v303_v54 = vmul.f32 0.01, %v243_v49  ;;  %v246_v55 = vadd.f32 %v995_v53, %v1361_v30  ;;  %v237_v56 = vpop.f32.mrb[7].mxu0  ;;  %1020 = vmatprep.mubr.bf16.mxu1 %v329_v51  ;;  %vm287_vm4 = vcmp.gt.f32.partialorder %v243_v49, 0.0 }
 0x125   :  { %v301_v57 = vmul.f32 0.01, %v235_v52  ;;  %v238_v58 = vadd.f32 %v1361_v30, %v237_v56  ;;  %1021 = vmatmul.mubr.bf16.vlgmr.msra.gmra.mrb[0].mxu1 %v330_v48  ;;  %vm285_vm5 = vcmp.gt.f32.partialorder %v235_v52, 0.0 }
 0x126   :  { %vm288_vm6 = vcmp.gt.f32.partialorder %v246_v55, 0.0  ;;  %v304_v59 = vmul.f32 0.01, %v246_v55  ;;  %1076 = vmatpush3.bf16.msra.mxu1 %v1112_v24  ;;  %v319_v61 = vsel %vm287_vm4, %v243_v49, %v303_v54 }
 0x127   :  { %vm286_vm7 = vcmp.gt.f32.partialorder %v238_v58, 0.0  ;;  %v302_v60 = vmul.f32 0.01, %v238_v58  ;;  %1069 = vmatprep.subr.bf16.mxu1 %v1338_v25  ;;  %v317_v0 = vsel %vm285_vm5, %v235_v52, %v301_v57 }
 0x128   :  { %v320_v62 = vsel %vm288_vm6, %v246_v55, %v304_v59 }
 0x129   :  { %v998_v63 = vpop.f32.mrb[8].mxu0  ;;  %v318_v1 = vsel %vm286_vm7, %v238_v58, %v302_v60  ;;  %v332_v2 = vpack.c.bf16 %v320_v62, %v319_v61 }
 0x12a   :  { %v259_v3 = vadd.f32 %v998_v63, %v1361_v30  ;;  %v250_v4 = vpop.f32.mrb[9].mxu0  ;;  %v331_v5 = vpack.c.bf16 %v318_v1, %v317_v0  ;;  %1077 = vmatpush3.bf16.msra.mxu1 %v1338_v25 }
 0x12b   :  { %v251_v6 = vadd.f32 %v1361_v30, %v250_v4  ;;  %v999_v7 = vpop.f32.mrb[10].mxu0  ;;  %1070 = vmatprep.subr.bf16.mxu1 %v1341_v26 }
 0x12c   :  { %v307_v8 = vmul.f32 0.01, %v259_v3  ;;  %v262_v9 = vadd.f32 %v999_v7, %v1361_v30  ;;  %v253_v10 = vpop.f32.mrb[11].mxu0  ;;  %1024 = vmatprep.mubr.bf16.mxu1 %v331_v5  ;;  %vm291_vm8 = vcmp.gt.f32.partialorder %v259_v3, 0.0 }
 0x12d   :  { %v305_v11 = vmul.f32 0.01, %v251_v6  ;;  %v254_v12 = vadd.f32 %v1361_v30, %v253_v10  ;;  %1025 = vmatmul.mubr.bf16.gmra.mrb[4].mxu1 %v332_v2  ;;  %vm289_vm9 = vcmp.gt.f32.partialorder %v251_v6, 0.0 }
 0x12e   :  { %vm292_vm10 = vcmp.gt.f32.partialorder %v262_v9, 0.0  ;;  %v308_v13 = vmul.f32 0.01, %v262_v9  ;;  %1078 = vmatpush3.bf16.msra.mxu1 %v1341_v26  ;;  %v323_v15 = vsel %vm291_vm8, %v259_v3, %v307_v8 }
 0x12f   :  { %vm290_vm11 = vcmp.gt.f32.partialorder %v254_v12, 0.0  ;;  %v306_v14 = vmul.f32 0.01, %v254_v12  ;;  %1071 = vmatprep.subr.bf16.mxu1 %v1345_v27  ;;  %v321_v18 = vsel %vm289_vm9, %v251_v6, %v305_v11 }
 0x130   :  { %v324_v16 = vsel %vm292_vm10, %v262_v9, %v308_v13 }
 0x131   :  { %v1002_v17 = vpop.f32.mrb[12].mxu0  ;;  %v322_v19 = vsel %vm290_vm11, %v254_v12, %v306_v14  ;;  %v334_v20 = vpack.c.bf16 %v324_v16, %v323_v15 }
 0x132   :  { %v275_v21 = vadd.f32 %v1002_v17, %v1361_v30  ;;  %v266_v22 = vpop.f32.mrb[13].mxu0  ;;  %v333_v23 = vpack.c.bf16 %v322_v19, %v321_v18  ;;  %1079 = vmatpush3.bf16.msra.mxu1 %v1345_v27 }
 0x133   :  { %v267_v24 = vadd.f32 %v1361_v30, %v266_v22  ;;  %v1003_v25 = vpop.f32.mrb[14].mxu0  ;;  %1072 = vmatprep.subr.bf16.mxu1 %v1349_v28 }
 0x134   :  { %v311_v26 = vmul.f32 0.01, %v275_v21  ;;  %v278_v31 = vadd.f32 %v1003_v25, %v1361_v30  ;;  %v269_v32 = vpop.f32.mrb[15].mxu0  ;;  %1028 = vmatprep.mubr.bf16.mxu1 %v333_v23  ;;  %vm295_vm12 = vcmp.gt.f32.partialorder %v275_v21, 0.0 }
 0x135   :  { %v309_v33 = vmul.f32 0.01, %v267_v24  ;;  %v270_v34 = vadd.f32 %v1361_v30, %v269_v32  ;;  %1029 = vmatmul.mubr.bf16.gmra.mrb[8].mxu1 %v334_v20  ;;  %vm293_vm13 = vcmp.gt.f32.partialorder %v267_v24, 0.0  ;;  %v1118_v30 = vld [vmem:[#allocation4 + $0x30] sm:$0xff]  }
 0x136   :  { %vm296_vm14 = vcmp.gt.f32.partialorder %v278_v31, 0.0  ;;  %v312_v35 = vmul.f32 0.01, %v278_v31  ;;  %1080 = vmatpush3.bf16.msra.mxu1 %v1349_v28  ;;  %v327_v36 = vsel %vm295_vm12, %v275_v21, %v311_v26  ;;  %1048 = vmatprep.subr.bf16.mxu0 %v1118_v30  ;;  %v1119_v28 = vld [vmem:[#allocation4 + $0x38] sm:$0xff]  }
 0x137   :  { %vm294_vm15 = vcmp.gt.f32.partialorder %v270_v34, 0.0  ;;  %v310_v27 = vmul.f32 0.01, %v270_v34  ;;  %1073 = vmatprep.subr.bf16.mxu1 %v1353_v29  ;;  %v325_v38 = vsel %vm293_vm13, %v267_v24, %v309_v33  ;;  %1049 = vmatpush3.bf16.msra.mxu0 %v1118_v30 }
 0x138   :  { %v328_v37 = vsel %vm296_vm14, %v278_v31, %v312_v35  ;;  %1050 = vmatprep.subr.bf16.mxu0 %v1119_v28 }
 0x139   :  { %v326_v39 = vsel %vm294_vm15, %v270_v34, %v310_v27  ;;  %v336_v40 = vpack.c.bf16 %v328_v37, %v327_v36 }
 0x13a   :  { %v335_v41 = vpack.c.bf16 %v326_v39, %v325_v38  ;;  %1081 = vmatpush3.bf16.msra.mxu1 %v1353_v29 }
 0x13b   :  { %1074 = vmatprep.subr.bf16.mxu1 %v1118_v30  ;;  %1051 = vmatpush3.bf16.msra.mxu0 %v1119_v28 }
 0x13c   :  { %1032 = vmatprep.mubr.bf16.mxu1 %v335_v41 }
 0x13d   :  { %1033 = vmatmul.mubr.bf16.gmra.mrb[12].mxu1 %v336_v40 }
 0x13e   :  { %1082 = vmatpush3.bf16.msra.mxu1 %v1118_v30 }
 0x13f   :  { %1075 = vmatprep.subr.bf16.mxu1 %v1119_v28 }
 0x142   :  { %1083 = vmatpush3.bf16.msra.mxu1 %v1119_v28 }
 0x1f8   :  { %v1022_v43 = vpop.f32.mrb[0].mxu1 }
 0x1f9   :  { %v448_v29 = vadd.f32 %v1022_v43, %v1392_v42  ;;  %v439_v44 = vpop.f32.mrb[1].mxu1 }
 0x1fa   :  { %v440_v45 = vadd.f32 %v1392_v42, %v439_v44  ;;  %v1023_v46 = vpop.f32.mrb[2].mxu1 }
 0x1fb   :  { %v520_v47 = vmul.f32 0.01, %v448_v29  ;;  %v451_v48 = vadd.f32 %v1023_v46, %v1392_v42  ;;  %v442_v49 = vpop.f32.mrb[3].mxu1  ;;  %vm504_vm0 = vcmp.gt.f32.partialorder %v448_v29, 0.0 }
 0x1fc   :  { %v518_v50 = vmul.f32 0.01, %v440_v45  ;;  %v443_v51 = vadd.f32 %v1392_v42, %v442_v49  ;;  %vm502_vm1 = vcmp.gt.f32.partialorder %v440_v45, 0.0 }
 0x1fd   :  { %vm505_vm2 = vcmp.gt.f32.partialorder %v451_v48, 0.0  ;;  %v521_v52 = vmul.f32 0.01, %v451_v48  ;;  %v536_v54 = vsel %vm504_vm0, %v448_v29, %v520_v47 }
 0x1fe   :  { %vm503_vm3 = vcmp.gt.f32.partialorder %v443_v51, 0.0  ;;  %v519_v53 = vmul.f32 0.01, %v443_v51  ;;  %v534_v58 = vsel %vm502_vm1, %v440_v45, %v518_v50 }
 0x1ff   :  { %v537_v55 = vsel %vm505_vm2, %v451_v48, %v521_v52 }
 0x200   :  { %v551_v56 = vpack.c.bf16 %v537_v55, %v536_v54  ;;  %v1026_v57 = vpop.f32.mrb[4].mxu1  ;;  %v535_v59 = vsel %vm503_vm3, %v443_v51, %v519_v53  ;;  %v915_v51 = vld [vmem:[%s1561_s4 + $0x2] ss:$0 sm:$0xff] }
 0x201   :  { %v464_v60 = vadd.f32 %v1026_v57, %v1392_v42  ;;  %v455_v61 = vpop.f32.mrb[5].mxu1  ;;  %v550_v62 = vpack.c.bf16 %v535_v59, %v534_v58 }
 0x202   :  { %v456_v63 = vadd.f32 %v1392_v42, %v455_v61  ;;  %v1027_v0 = vpop.f32.mrb[6].mxu1 }
 0x203   :  { %v524_v1 = vmul.f32 0.01, %v464_v60  ;;  %v467_v2 = vadd.f32 %v1027_v0, %v1392_v42  ;;  %v458_v3 = vpop.f32.mrb[7].mxu1  ;;  %1052 = vmatprep.mubr.bf16.mxu0 %v550_v62  ;;  %vm508_vm4 = vcmp.gt.f32.partialorder %v464_v60, 0.0 }
 0x204   :  { %v522_v4 = vmul.f32 0.01, %v456_v63  ;;  %v459_v5 = vadd.f32 %v1392_v42, %v458_v3  ;;  %1053 = vmatmul.mubr.bf16.vlgmr.msra.gmra.mrb[16].mxu0 %v551_v56  ;;  %vm506_vm5 = vcmp.gt.f32.partialorder %v456_v63, 0.0 }
 0x205   :  { %vm509_vm6 = vcmp.gt.f32.partialorder %v467_v2, 0.0  ;;  %v525_v6 = vmul.f32 0.01, %v467_v2  ;;  %v540_v8 = vsel %vm508_vm4, %v464_v60, %v524_v1 }
 0x206   :  { %vm507_vm7 = vcmp.gt.f32.partialorder %v459_v5, 0.0  ;;  %v523_v7 = vmul.f32 0.01, %v459_v5  ;;  %v538_v11 = vsel %vm506_vm5, %v456_v63, %v522_v4 }
 0x207   :  { %v541_v9 = vsel %vm509_vm6, %v467_v2, %v525_v6 }
 0x208   :  { %v1030_v10 = vpop.f32.mrb[8].mxu1  ;;  %v539_v12 = vsel %vm507_vm7, %v459_v5, %v523_v7  ;;  %v553_v13 = vpack.c.bf16 %v541_v9, %v540_v8 }
 0x209   :  { %v480_v14 = vadd.f32 %v1030_v10, %v1392_v42  ;;  %v471_v15 = vpop.f32.mrb[9].mxu1  ;;  %v552_v16 = vpack.c.bf16 %v539_v12, %v538_v11 }
 0x20a   :  { %v472_v17 = vadd.f32 %v1392_v42, %v471_v15  ;;  %v1031_v18 = vpop.f32.mrb[10].mxu1 }
 0x20b   :  { %v528_v19 = vmul.f32 0.01, %v480_v14  ;;  %v483_v20 = vadd.f32 %v1031_v18, %v1392_v42  ;;  %v474_v21 = vpop.f32.mrb[11].mxu1  ;;  %1056 = vmatprep.mubr.bf16.mxu0 %v552_v16  ;;  %vm512_vm8 = vcmp.gt.f32.partialorder %v480_v14, 0.0 }
 0x20c   :  { %v526_v22 = vmul.f32 0.01, %v472_v17  ;;  %v475_v23 = vadd.f32 %v1392_v42, %v474_v21  ;;  %1057 = vmatmul.mubr.bf16.gmra.mrb[20].mxu0 %v553_v13  ;;  %vm510_vm9 = vcmp.gt.f32.partialorder %v472_v17, 0.0 }
 0x20d   :  { %vm513_vm10 = vcmp.gt.f32.partialorder %v483_v20, 0.0  ;;  %v529_v24 = vmul.f32 0.01, %v483_v20  ;;  %v544_v26 = vsel %vm512_vm8, %v480_v14, %v528_v19 }
 0x20e   :  { %vm511_vm11 = vcmp.gt.f32.partialorder %v475_v23, 0.0  ;;  %v527_v25 = vmul.f32 0.01, %v475_v23  ;;  %v542_v34 = vsel %vm510_vm9, %v472_v17, %v526_v22 }
 0x20f   :  { %v545_v31 = vsel %vm513_vm10, %v483_v20, %v529_v24 }
 0x210   :  { %v555_v32 = vpack.c.bf16 %v545_v31, %v544_v26  ;;  %v1034_v33 = vpop.f32.mrb[12].mxu1  ;;  %v543_v35 = vsel %vm511_vm11, %v475_v23, %v527_v25 }
 0x211   :  { %v496_v27 = vadd.f32 %v1034_v33, %v1392_v42  ;;  %v487_v36 = vpop.f32.mrb[13].mxu1  ;;  %v554_v37 = vpack.c.bf16 %v543_v35, %v542_v34 }
 0x212   :  { %v488_v38 = vadd.f32 %v1392_v42, %v487_v36  ;;  %v1035_v39 = vpop.f32.mrb[14].mxu1 }
 0x213   :  { %v532_v40 = vmul.f32 0.01, %v496_v27  ;;  %v499_v41 = vadd.f32 %v1035_v39, %v1392_v42  ;;  %v490_v30 = vpop.f32.mrb[15].mxu1  ;;  %1060 = vmatprep.mubr.bf16.mxu1 %v554_v37  ;;  %vm516_vm12 = vcmp.gt.f32.partialorder %v496_v27, 0.0 }
 0x214   :  { %v530_v28 = vmul.f32 0.01, %v488_v38  ;;  %v491_v43 = vadd.f32 %v1392_v42, %v490_v30  ;;  %1061 = vmatmul.mubr.bf16.vlgmr.msra.gmra.mrb[16].mxu1 %v555_v32  ;;  %vm514_vm13 = vcmp.gt.f32.partialorder %v488_v38, 0.0 }
 0x215   :  { %vm517_vm14 = vcmp.gt.f32.partialorder %v499_v41, 0.0  ;;  %v533_v29 = vmul.f32 0.01, %v499_v41  ;;  %v548_v45 = vsel %vm516_vm12, %v496_v27, %v532_v40 }
 0x216   :  { %vm515_vm15 = vcmp.gt.f32.partialorder %v491_v43, 0.0  ;;  %v531_v44 = vmul.f32 0.01, %v491_v43  ;;  %v546_v47 = vsel %vm514_vm13, %v488_v38, %v530_v28 }
 0x217   :  { %v549_v46 = vsel %vm517_vm14, %v499_v41, %v533_v29 }
 0x218   :  { %v547_v48 = vsel %vm515_vm15, %v491_v43, %v531_v44  ;;  %v557_v49 = vpack.c.bf16 %v549_v46, %v548_v45 }
 0x219   :  { %v556_v50 = vpack.c.bf16 %v547_v48, %v546_v47 }
 0x21b   :  { %1064 = vmatprep.mubr.bf16.mxu1 %v556_v50 }
 0x21c   :  { %1065 = vmatmul.mubr.bf16.gmra.mrb[20].mxu1 %v557_v49 }
 0x2d7   :  { %v1054_v52 = vpop.f32.mrb[16].mxu0 }
 0x2d8   :  { %v669_v42 = vadd.f32 %v1054_v52, %v915_v51  ;;  %v660_v53 = vpop.f32.mrb[17].mxu0 }
 0x2d9   :  { %v661_v54 = vadd.f32 %v915_v51, %v660_v53  ;;  %v1055_v55 = vpop.f32.mrb[18].mxu0 }
 0x2da   :  { %727 = vmax.xlane.f32.xlu1 %v669_v42  ;;  %v663_v56 = vpop.f32.mrb[19].mxu0  ;;  %v672_v57 = vadd.f32 %v1055_v55, %v915_v51 }
 0x2db   :  { %723 = vmax.xlane.f32.xlu0 %v661_v54  ;;  %v664_v58 = vadd.f32 %v915_v51, %v663_v56 }
 0x2de   :  { %729 = vmax.xlane.f32.xlu1 %v672_v57 }
 0x2df   :  { %v1058_v59 = vpop.f32.mrb[20].mxu0  ;;  %725 = vmax.xlane.f32.xlu0 %v664_v58 }
 0x2e0   :  { %v685_v60 = vadd.f32 %v1058_v59, %v915_v51  ;;  %v676_v61 = vpop.f32.mrb[21].mxu0 }
 0x2e1   :  { %v1059_v62 = vpop.f32.mrb[22].mxu0  ;;  %v677_v1 = vadd.f32 %v915_v51, %v676_v61 }
 0x2e2   :  { %v688_v63 = vadd.f32 %v1059_v62, %v915_v51  ;;  %v679_v0 = vpop.f32.mrb[23].mxu0 }
 0x2e3   :  { %735 = vmax.xlane.f32.xlu0 %v685_v60  ;;  %v680_v2 = vadd.f32 %v915_v51, %v679_v0 }
 0x2e4   :  { %737 = vmax.xlane.f32.xlu1 %v688_v63 }
 0x2e7   :  { %v1062_v3 = vpop.f32.mrb[16].mxu1  ;;  %731 = vmax.xlane.f32.xlu0 %v677_v1 }
 0x2e8   :  { %v1413_v4 = vadd.f32 %v1062_v3, %v915_v51  ;;  %v692_v5 = vpop.f32.mrb[17].mxu1  ;;  %733 = vmax.xlane.f32.xlu1 %v680_v2 }
 0x2e9   :  { %v1063_v6 = vpop.f32.mrb[18].mxu1  ;;  %v1419_v9 = vadd.f32 %v915_v51, %v692_v5 }
 0x2ea   :  { %v1415_v7 = vadd.f32 %v1063_v6, %v915_v51  ;;  %v695_v8 = vpop.f32.mrb[19].mxu1 }
 0x2eb   :  { %743 = vmax.xlane.f32.xlu0 %v1413_v4  ;;  %v1421_v10 = vadd.f32 %v915_v51, %v695_v8 }
 0x2ec   :  { %745 = vmax.xlane.f32.xlu1 %v1415_v7 }
 0x2ef   :  { %v1066_v11 = vpop.f32.mrb[20].mxu1  ;;  %739 = vmax.xlane.f32.xlu0 %v1419_v9 }
 0x2f0   :  { %v708_v12 = vpop.f32.mrb[21].mxu1  ;;  %741 = vmax.xlane.f32.xlu1 %v1421_v10  ;;  %v1430_v17 = vadd.f32 %v1066_v11, %v915_v51 }
 0x2f1   :  { %v1425_v13 = vadd.f32 %v915_v51, %v708_v12  ;;  %v1067_v14 = vpop.f32.mrb[22].mxu1 }
 0x2f2   :  { %v711_v15 = vpop.f32.mrb[23].mxu1  ;;  %v1433_v18 = vadd.f32 %v1067_v14, %v915_v51 }
 0x2f3   :  { %v1427_v16 = vadd.f32 %v915_v51, %v711_v15  ;;  %747 = vmax.xlane.f32.xlu0 %v1425_v13 }
 0x2f5   :  { %749 = vmax.xlane.f32.xlu1 %v1427_v16 }
 0x2f7   :  { %751 = vmax.xlane.f32.xlu0 %v1430_v17 }
 0x2f9   :  { %753 = vmax.xlane.f32.xlu1 %v1433_v18 }
 0x367   :  { %v728_v19 = vpop.xlane.xlu1 %727 }
 0x368   :  { %v757_v20 = vsub.f32 %v669_v42, %v728_v19  ;;  %v724_v21 = vpop.xlane.xlu0 %723 }
 0x369   :  { %v755_v22 = vsub.f32 %v661_v54, %v724_v21 }
 0x36a   :  { %v775_v23 = vmul.f32 1.442695, %v757_v20 }
 0x36b   :  { %v771_v24 = vmul.f32 1.442695, %v755_v22  ;;  %v730_v25 = vpop.xlane.xlu1 %729 }
 0x36c   :  { %1120 = vpow2.f32 %v775_v23  ;;  %v758_v26 = vsub.f32 %v672_v57, %v730_v25  ;;  %v726_v31 = vpop.xlane.xlu0 %725 }
 0x36d   :  { %v756_v32 = vsub.f32 %v664_v58, %v726_v31  ;;  %1122 = vpow2.f32 %v771_v24 }
 0x36e   :  { %v777_v33 = vmul.f32 1.442695, %v758_v26 }
 0x36f   :  { %v773_v34 = vmul.f32 1.442695, %v756_v32 }
 0x370   :  { %1124 = vpow2.f32 %v777_v33  ;;  %v736_v35 = vpop.xlane.xlu0 %735 }
 0x371   :  { %v761_v27 = vsub.f32 %v685_v60, %v736_v35  ;;  %v738_v36 = vpop.xlane.xlu1 %737  ;;  %1126 = vpow2.f32 %v773_v34 }
 0x372   :  { %v762_v37 = vsub.f32 %v688_v63, %v738_v36 }
 0x373   :  { %v783_v38 = vmul.f32 1.442695, %v761_v27 }
 0x374   :  { %v785_v39 = vmul.f32 1.442695, %v762_v37  ;;  %v732_v40 = vpop.xlane.xlu0 %731 }
 0x375   :  { %1128 = vpow2.f32 %v783_v38  ;;  %v759_v41 = vsub.f32 %v677_v1, %v732_v40  ;;  %v734_v30 = vpop.xlane.xlu1 %733 }
 0x376   :  { %v1437_v28 = vpop.eup %1120  ;;  %v760_v43 = vsub.f32 %v680_v2, %v734_v30  ;;  %1130 = vpow2.f32 %v785_v39 }
 0x377   :  { %v779_v29 = vmul.f32 1.442695, %v759_v41  ;;  %807 = vadd.xlane.f32.xlu0 %v1437_v28  ;;  %v1440_v46 = vpop.eup %1122 }
 0x378   :  { %v781_v44 = vmul.f32 1.442695, %v760_v43  ;;  %v744_v45 = vpop.xlane.xlu0 %743 }
 0x379   :  { %1132 = vpow2.f32 %v779_v29  ;;  %v765_v47 = vsub.f32 %v1413_v4, %v744_v45  ;;  %v746_v48 = vpop.xlane.xlu1 %745 }
 0x37a   :  { %v1443_v49 = vpop.eup %1124  ;;  %v766_v50 = vsub.f32 %v1415_v7, %v746_v48  ;;  %1134 = vpow2.f32 %v781_v44 }
 0x37b   :  { %v791_v51 = vmul.f32 1.442695, %v765_v47  ;;  %809 = vadd.xlane.f32.xlu1 %v1443_v49  ;;  %803 = vadd.xlane.f32.xlu0 %v1440_v46  ;;  %v1449_v55 = vpop.eup %1126 }
 0x37c   :  { %v793_v52 = vmul.f32 1.442695, %v766_v50  ;;  %v740_v42 = vpop.xlane.xlu0 %739 }
 0x37d   :  { %1136 = vpow2.f32 %v791_v51  ;;  %v763_v53 = vsub.f32 %v1419_v9, %v740_v42  ;;  %v742_v54 = vpop.xlane.xlu1 %741 }
 0x37e   :  { %v764_v56 = vsub.f32 %v1421_v10, %v742_v54  ;;  %1138 = vpow2.f32 %v793_v52 }
 0x37f   :  { %v1452_v57 = vpop.eup %1128  ;;  %v787_v58 = vmul.f32 1.442695, %v763_v53  ;;  %805 = vadd.xlane.f32.xlu1 %v1449_v55 }
 0x380   :  { %v789_v59 = vmul.f32 1.442695, %v764_v56  ;;  %815 = vadd.xlane.f32.xlu0 %v1452_v57  ;;  %v748_v60 = vpop.xlane.xlu0 %747  ;;  %v1457_v62 = vpop.eup %1130 }
 0x381   :  { %1140 = vpow2.f32 %v787_v58  ;;  %v767_v61 = vsub.f32 %v1425_v13, %v748_v60 }
 0x382   :  { %v750_v63 = vpop.xlane.xlu1 %749  ;;  %1142 = vpow2.f32 %v789_v59 }
 0x383   :  { %v1459_v0 = vpop.eup %1132  ;;  %v795_v1 = vmul.f32 1.442695, %v767_v61  ;;  %v768_v2 = vsub.f32 %v1427_v16, %v750_v63  ;;  %817 = vadd.xlane.f32.xlu1 %v1457_v62 }
 0x384   :  { %811 = vadd.xlane.f32.xlu0 %v1459_v0  ;;  %v752_v3 = vpop.xlane.xlu0 %751  ;;  %v1465_v6 = vpop.eup %1134 }
 0x385   :  { %1144 = vpow2.f32 %v795_v1  ;;  %v797_v4 = vmul.f32 1.442695, %v768_v2  ;;  %v769_v5 = vsub.f32 %v1430_v17, %v752_v3 }
 0x386   :  { %v754_v7 = vpop.xlane.xlu1 %753 }
 0x387   :  { %v1467_v8 = vpop.eup %1136  ;;  %1146 = vpow2.f32 %v797_v4  ;;  %v799_v9 = vmul.f32 1.442695, %v769_v5  ;;  %v770_v10 = vsub.f32 %v1433_v18, %v754_v7  ;;  %813 = vadd.xlane.f32.xlu1 %v1465_v6 }
 0x388   :  { %823 = vadd.xlane.f32.xlu0 %v1467_v8  ;;  %v1472_v12 = vpop.eup %1138 }
 0x389   :  { %1148 = vpow2.f32 %v799_v9  ;;  %v801_v11 = vmul.f32 1.442695, %v770_v10 }
 0x38b   :  { %v1474_v13 = vpop.eup %1140  ;;  %1150 = vpow2.f32 %v801_v11  ;;  %825 = vadd.xlane.f32.xlu1 %v1472_v12 }
 0x38c   :  { %819 = vadd.xlane.f32.xlu0 %v1474_v13  ;;  %v1478_v14 = vpop.eup %1142 }
 0x38f   :  { %v1480_v15 = vpop.eup %1144  ;;  %821 = vadd.xlane.f32.xlu1 %v1478_v14 }
 0x390   :  { %827 = vadd.xlane.f32.xlu0 %v1480_v15 }
 0x391   :  { %v1484_v16 = vpop.eup %1146 }
 0x393   :  { %v1486_v17 = vpop.eup %1148  ;;  %829 = vadd.xlane.f32.xlu1 %v1484_v16 }
 0x394   :  { %831 = vadd.xlane.f32.xlu0 %v1486_v17 }
 0x395   :  { %v1490_v18 = vpop.eup %1150 }
 0x397   :  { %833 = vadd.xlane.f32.xlu1 %v1490_v18 }
 0x404   :  { %v808_v19 = vpop.xlane.xlu0 %807 }
 0x405   :  { %1152 = vrcp.f32 %v808_v19 }
 0x408   :  { %v810_v20 = vpop.xlane.xlu1 %809  ;;  %v804_v21 = vpop.xlane.xlu0 %803 }
 0x409   :  { %1154 = vrcp.f32 %v810_v20 }
 0x40a   :  { %1156 = vrcp.f32 %v804_v21 }
 0x40c   :  { %v806_v22 = vpop.xlane.xlu1 %805 }
 0x40d   :  { %1158 = vrcp.f32 %v806_v22  ;;  %v816_v23 = vpop.xlane.xlu0 %815 }
 0x40e   :  { %1160 = vrcp.f32 %v816_v23 }
 0x40f   :  { %v1153_v24 = vpop.eup %1152 }
 0x410   :  { %v853_v25 = vmul.f32 %v1153_v24, %v1437_v28  ;;  %v818_v26 = vpop.xlane.xlu1 %817 }
 0x411   :  { %1162 = vrcp.f32 %v818_v26  ;;  %v812_v31 = vpop.xlane.xlu0 %811 }
 0x412   :  { %869 = vst [vmem:[%s1562_s5 + $0x10] sm:$0xff] %v853_v25  ;;  %1164 = vrcp.f32 %v812_v31 }
 0x413   :  { %v1155_v32 = vpop.eup %1154 }
 0x414   :  { %v1157_v33 = vpop.eup %1156  ;;  %v854_v34 = vmul.f32 %v1155_v32, %v1443_v49  ;;  %v814_v35 = vpop.xlane.xlu1 %813 }
 0x415   :  { %v851_v27 = vmul.f32 %v1157_v33, %v1440_v46  ;;  %1166 = vrcp.f32 %v814_v35  ;;  %v824_v36 = vpop.xlane.xlu0 %823 }
 0x416   :  { %870 = vst [vmem:[%s1562_s5 + $0x18] sm:$0xff] %v854_v34  ;;  %1168 = vrcp.f32 %v824_v36 }
 0x417   :  { %v1159_v37 = vpop.eup %1158  ;;  %867 = vst [vmem:[%s1562_s5] sm:$0xff] %v851_v27 }
 0x418   :  { %v1161_v38 = vpop.eup %1160  ;;  %v852_v39 = vmul.f32 %v1159_v37, %v1449_v55  ;;  %v826_v40 = vpop.xlane.xlu1 %825 }
 0x419   :  { %v857_v41 = vmul.f32 %v1161_v38, %v1452_v57  ;;  %1170 = vrcp.f32 %v826_v40  ;;  %v820_v30 = vpop.xlane.xlu0 %819 }
 0x41a   :  { %868 = vst [vmem:[%s1562_s5 + $0x8] sm:$0xff] %v852_v39  ;;  %1172 = vrcp.f32 %v820_v30 }
 0x41b   :  { %v1163_v28 = vpop.eup %1162  ;;  %873 = vst [vmem:[%s1562_s5 + $0x30] sm:$0xff] %v857_v41 }
 0x41c   :  { %v1165_v43 = vpop.eup %1164  ;;  %v858_v29 = vmul.f32 %v1163_v28, %v1457_v62  ;;  %v822_v44 = vpop.xlane.xlu1 %821 }
 0x41d   :  { %v855_v45 = vmul.f32 %v1165_v43, %v1459_v0  ;;  %1174 = vrcp.f32 %v822_v44  ;;  %v828_v46 = vpop.xlane.xlu0 %827 }
 0x41e   :  { %874 = vst [vmem:[%s1562_s5 + $0x38] sm:$0xff] %v858_v29  ;;  %1176 = vrcp.f32 %v828_v46 }
 0x41f   :  { %v1167_v47 = vpop.eup %1166  ;;  %871 = vst [vmem:[%s1562_s5 + $0x20] sm:$0xff] %v855_v45 }
 0x420   :  { %v1169_v48 = vpop.eup %1168  ;;  %v856_v49 = vmul.f32 %v1167_v47, %v1465_v6  ;;  %v830_v50 = vpop.xlane.xlu1 %829 }
 0x421   :  { %v861_v51 = vmul.f32 %v1169_v48, %v1467_v8  ;;  %1178 = vrcp.f32 %v830_v50  ;;  %v832_v52 = vpop.xlane.xlu0 %831 }
 0x422   :  { %872 = vst [vmem:[%s1562_s5 + $0x28] sm:$0xff] %v856_v49  ;;  %1180 = vrcp.f32 %v832_v52 }
 0x423   :  { %v1171_v42 = vpop.eup %1170  ;;  %877 = vst [vmem:[%s1562_s5 + $0x50] sm:$0xff] %v861_v51 }
 0x424   :  { %v1173_v53 = vpop.eup %1172  ;;  %v862_v54 = vmul.f32 %v1171_v42, %v1472_v12  ;;  %v834_v55 = vpop.xlane.xlu1 %833 }
 0x425   :  { %v859_v56 = vmul.f32 %v1173_v53, %v1474_v13  ;;  %1182 = vrcp.f32 %v834_v55 }
 0x426   :  { %878 = vst [vmem:[%s1562_s5 + $0x58] sm:$0xff] %v862_v54 }
 0x427   :  { %v1175_v57 = vpop.eup %1174  ;;  %875 = vst [vmem:[%s1562_s5 + $0x40] sm:$0xff] %v859_v56 }
 0x428   :  { %v1177_v58 = vpop.eup %1176  ;;  %v860_v59 = vmul.f32 %v1175_v57, %v1478_v14 }
 0x429   :  { %v863_v60 = vmul.f32 %v1177_v58, %v1480_v15 }
 0x42a   :  { %876 = vst [vmem:[%s1562_s5 + $0x48] sm:$0xff] %v860_v59 }
 0x42b   :  { %v1179_v61 = vpop.eup %1178  ;;  %879 = vst [vmem:[%s1562_s5 + $0x60] sm:$0xff] %v863_v60 }
 0x42c   :  { %v1181_v62 = vpop.eup %1180  ;;  %v864_v63 = vmul.f32 %v1179_v61, %v1484_v16 }
 0x42d   :  { %v865_v0 = vmul.f32 %v1181_v62, %v1486_v17 }
 0x42e   :  { %880 = vst [vmem:[%s1562_s5 + $0x68] sm:$0xff] %v864_v63 }
 0x42f   :  { %v1183_v1 = vpop.eup %1182  ;;  %881 = vst [vmem:[%s1562_s5 + $0x70] sm:$0xff] %v865_v0 }
 0x430   :  { %v866_v2 = vmul.f32 %v1183_v1, %v1490_v18 }
 0x432   :  { %882 = vst [vmem:[%s1562_s5 + $0x78] sm:$0xff] %v866_v2 }
 0x433   :  { %887 = vsyncpa [#allocation3], 1 }
 0x434   :  { %888 = vsyncpa [#allocation5], 1 }

</bundles_post_ra>
